<compile_context>
chip_gen: v6e
topology: v6e:2x2x1
jax: 0.10.0
libtpu: 0.0.40
codegen_flags: <defaults>
</compile_context>

<pallas_src>
import jax
import jax.numpy as jnp
from jax import lax
from jax.experimental import pallas as pl
from jax.experimental.pallas import tpu as pltpu

EPS = 1e-5


def _round_up(a, b):
    return -(-a // b) * b


def _tensorcores_per_chip():
    """TensorCores a single Pallas call can shard a 'parallel' grid across."""
    try:
        kind = jax.devices()[0].device_kind.lower()
    except Exception:  # non-TPU / interpret backends
        return 1
    # v7x exposes 2 TensorCores per chip; v4/v5p megacore also shard grids.
    if "v7" in kind or "v4" in kind or "v5p" in kind:
        return 2
    return 1  # v5e / v6e: single TensorCore


def _node_kernel(pt_ref, wt_ref, sh_ref, o_ref):
    # ReLU commutes with patch extraction / transposition, so apply it to the
    # transposed patch tile; zero padding (conv border, K pad, M pad) stays 0.
    p = jnp.maximum(pt_ref[...], 0)                           # (K, tile_m)
    acc = jnp.dot(wt_ref[...], p,                             # (Cout, tile_m)
                  preferred_element_type=jnp.float32)
    # Folded BatchNorm shift of both branches, broadcast along the lane axis.
    o_ref[...] = acc + sh_ref[...]


def _im2col_t(x_cmajor, stride):
    """3x3 / pad=1 transposed im2col from a channel-major input.

    x_cmajor: (C2, N, H, W).  Returns (P^T, Ho, Wo) with P^T of shape
    (9*C2, N*Ho*Wo); rows ordered (kh, kw, c2), columns ordered (n, ho, wo).
    The stack is already in row-major (K, M) order, so the final reshape is
    copy-free (no transpose of the 9x-expanded tensor).
    """
    c2, n, h, w = x_cmajor.shape
    ho = (h + 2 - 3) // stride + 1
    wo = (w + 2 - 3) // stride + 1
    xp = jnp.pad(x_cmajor, ((0, 0), (0, 0), (1, 1), (1, 1)))
    taps = []
    for kh in range(3):
        for kw in range(3):
            taps.append(
                xp[:, :, kh:kh + (ho - 1) * stride + 1:stride,
                         kw:kw + (wo - 1) * stride + 1:stride])
    pat = jnp.stack(taps, axis=0)                  # (9, C2, N, Ho, Wo)
    return pat.reshape(9 * c2, n * ho * wo), ho, wo


def _fold_bn(gamma, beta, mean, var):
    scale = gamma / jnp.sqrt(var + EPS)
    shift = beta - mean * scale
    return scale, shift


def node_ti_forward(x_nchw, y_nchw, params, stride=1, tile_m=2048, use_bf16=True):
    """Pallas implementation of Node_TI.forward.  Inputs/outputs are NCHW f32."""
    n, cin, h, w = x_nchw.shape
    cout = params["wx"].shape[0]
    compute_dtype = jnp.bfloat16 if use_bf16 else jnp.float32

    # NCHW -> channel-major (2Cin, N, H, W); fusing the two branch inputs
    # along the channel axis turns the node into a single GEMM over
    # K = 9 * 2 * Cin, and channel-major layout makes the im2col stack below
    # land directly in (K, M) order (no post-stack transpose through HBM).
    xt = jnp.transpose(x_nchw, (1, 0, 2, 3))
    yt = jnp.transpose(y_nchw, (1, 0, 2, 3))
    xy = jnp.concatenate([xt, yt], axis=0).astype(compute_dtype)

    p_t, ho, wo = _im2col_t(xy, stride)            # (K, M)
    k2, m = p_t.shape

    # Fold the (eval-mode) BatchNorm scale of each branch into its conv weight
    # and fold both shifts into a single bias column; the node-level add then
    # collapses into a concat along K.
    sx, bx = _fold_bn(params["gx"], params["bx"], params["mx"], params["vx"])
    sy, by = _fold_bn(params["gy"], params["by"], params["my"], params["vy"])
    wx_f = params["wx"].astype(jnp.float32) * sx[:, None, None, None]  # (Cout,Cin,3,3)
    wy_f = params["wy"].astype(jnp.float32) * sy[:, None, None, None]
    w_cat = jnp.concatenate([wx_f, wy_f], axis=1)               # (Cout, 2Cin, 3, 3)
    w_t = jnp.transpose(w_cat, (0, 2, 3, 1)).reshape(cout, k2)  # cols = (kh,kw,c2)
    w_t = w_t.astype(compute_dtype)
    shift = (bx + by).reshape(cout, 1).astype(jnp.float32)

    # K sits on the sublane axis of the P^T tiles; pad it to the packing
    # granularity of the compute dtype (16 for bf16, 8 for f32) so every
    # sublane tile is full (zero rows contribute nothing).
    k_gran = 16 if use_bf16 else 8
    k_pad = _round_up(k2, k_gran)
    if k_pad != k2:
        p_t = jnp.pad(p_t, ((0, k_pad - k2), (0, 0)))
        w_t = jnp.pad(w_t, ((0, 0), (0, k_pad - k2)))

    # Tile over the lane-dense M axis.  Big tiles amortize per-step overhead
    # and widen the output store; on multi-TensorCore chips (v7x) make sure
    # each core still gets >= 2 grid steps so per-core double-buffering stays
    # alive.  On single-TC chips (v5e/v6e) never force-split a single tile.
    ntc = _tensorcores_per_chip()
    m128 = _round_up(m, 128)
    tile_m = min(_round_up(tile_m, 128), m128)
    if ntc > 1:
        target_steps = 2 * ntc
        if m128 // tile_m < target_steps and m128 >= target_steps * 128:
            tile_m = max(128, (m128 // target_steps) // 128 * 128)
    m_pad = _round_up(m, tile_m)
    if m_pad != m:
        p_t = jnp.pad(p_t, ((0, 0), (0, m_pad - m)))
    grid = (m_pad // tile_m,)

    # VMEM budget: double-buffered P^T tile, the in-kernel relu temporary,
    # (grid-invariant but default-double-buffered) W^T + shift, the f32
    # matmul result and the double-buffered output tile.  Sized per call,
    # capped well under v7x's 64 MiB physical VMEM.
    isz = 2 if use_bf16 else 4
    vmem_est = (2 * k_pad * tile_m * isz        # P^T tile (double-buffered)
                + k_pad * tile_m * isz          # relu temporary
                + 2 * cout * k_pad * isz        # W^T
                + 2 * cout * 128 * 4            # shift (lane-padded)
                + cout * tile_m * 4             # f32 matmul result
                + 2 * cout * tile_m * 4)        # output tile (double-buffered)
    vmem_limit = int(min(max(2 * vmem_est + (4 << 20), 16 << 20), 48 << 20))

    out_t = pl.pallas_call(
        _node_kernel,
        out_shape=jax.ShapeDtypeStruct((cout, m_pad), jnp.float32),
        grid_spec=pltpu.PrefetchScalarGridSpec(
            num_scalar_prefetch=0,
            grid=grid,
            in_specs=[
                pl.BlockSpec((k_pad, tile_m), lambda i: (0, i)),  # P^T tile (lanes = M)
                pl.BlockSpec((cout, k_pad), lambda i: (0, 0)),    # fused, BN-folded W^T
                pl.BlockSpec((cout, 1), lambda i: (0, 0)),        # BN shift column
            ],
            out_specs=pl.BlockSpec((cout, tile_m), lambda i: (0, i)),
        ),
        compiler_params=pltpu.CompilerParams(
            dimension_semantics=("parallel",),
            vmem_limit_bytes=vmem_limit,
        ),
        cost_estimate=pl.CostEstimate(
            flops=2 * m_pad * k_pad * cout,
            transcendentals=0,
            bytes_accessed=int(p_t.size * p_t.dtype.itemsize
                               + w_t.size * w_t.dtype.itemsize
                               + shift.size * 4
                               + cout * m_pad * 4),
        ),
    )(p_t, w_t, shift)

    out = out_t[:, :m].reshape(cout, n, ho, wo)
    # Output-side transpose is cheap (Cout rows only); keep NCHW to match the
    # PyTorch module's interface.
    return jnp.transpose(out, (1, 0, 2, 3))


def _ref_branch(x_nchw, w_oihw, gamma, beta, mean, var, stride):
    """Pure-JAX f32 reference for one Operation_TI branch (ReLU->Conv3x3->BN)."""
    x = jnp.transpose(x_nchw, (0, 2, 3, 1)).astype(jnp.float32)
    x = jnp.maximum(x, 0.0)
    w_hwio = jnp.transpose(w_oihw, (2, 3, 1, 0)).astype(jnp.float32)
    y = lax.conv_general_dilated(
        x, w_hwio, (stride, stride), ((1, 1), (1, 1)),
        dimension_numbers=("NHWC", "HWIO", "NHWC"))
    scale, shift = _fold_bn(gamma, beta, mean, var)
    y = y * scale + shift
    return jnp.transpose(y, (0, 3, 1, 2))


if __name__ == "__main__":
    # Small shapes consistent with the module: batch=2, in-channels=4,
    # spatial=16x16, node channels=8, stride=1.
    N, CIN, H, W = 2, 4, 16, 16
    COUT, STRIDE = 8, 1

    key = jax.random.PRNGKey(0)
    kx, ky, kwx, kwy, kbn = jax.random.split(key, 5)
    x = jax.random.normal(kx, (N, CIN, H, W), jnp.float32)
    y = jax.random.normal(ky, (N, CIN, H, W), jnp.float32)

    kbn = jax.random.split(kbn, 8)
    params = {
        "wx": 0.1 * jax.random.normal(kwx, (COUT, CIN, 3, 3), jnp.float32),
        "wy": 0.1 * jax.random.normal(kwy, (COUT, CIN, 3, 3), jnp.float32),
        "gx": 0.5 + jax.random.uniform(kbn[0], (COUT,), jnp.float32),
        "bx": 0.1 * jax.random.normal(kbn[1], (COUT,), jnp.float32),
        "mx": 0.1 * jax.random.normal(kbn[2], (COUT,), jnp.float32),
        "vx": 0.5 + jax.random.uniform(kbn[3], (COUT,), jnp.float32),
        "gy": 0.5 + jax.random.uniform(kbn[4], (COUT,), jnp.float32),
        "by": 0.1 * jax.random.normal(kbn[5], (COUT,), jnp.float32),
        "my": 0.1 * jax.random.normal(kbn[6], (COUT,), jnp.float32),
        "vy": 0.5 + jax.random.uniform(kbn[7], (COUT,), jnp.float32),
    }

    # Fast (bf16-operand) path and exact f32 path through the same kernel.
    out = jax.block_until_ready(node_ti_forward(x, y, params, stride=STRIDE))
    out_f32 = jax.block_until_ready(
        node_ti_forward(x, y, params, stride=STRIDE, use_bf16=False))

    ref = (_ref_branch(x, params["wx"], params["gx"], params["bx"],
                       params["mx"], params["vx"], STRIDE)
           + _ref_branch(y, params["wy"], params["gy"], params["by"],
                         params["my"], params["vy"], STRIDE))

    assert out.shape == (N, COUT, H // STRIDE, W // STRIDE), out.shape
    # f32 path must match the module to fp roundoff.
    assert jnp.allclose(out_f32, ref, atol=1e-4, rtol=1e-4), \
        float(jnp.max(jnp.abs(out_f32 - ref)))
    # bf16 operand rounding (inputs ~N(0,1), K=72, BN scale ~2) gives O(5e-2)
    # worst-case deviation from the f32 reference; loose tolerance by design.
    assert jnp.allclose(out, ref, atol=2e-1, rtol=2e-1), \
        float(jnp.max(jnp.abs(out - ref)))

    print("KERNEL_OK")
</pallas_src>

<mosaic_0001>
module attributes {stable_mosaic.version = 11 : i64} {
  func.func @_node_kernel(%arg0: i32, %arg1: memref<80x512xbf16, #tpu.memory_space<vmem>>, %arg2: memref<8x80xbf16, #tpu.memory_space<vmem>>, %arg3: memref<8x1xf32, #tpu.memory_space<vmem>>, %arg4: memref<8x512xf32, #tpu.memory_space<vmem>>) attributes {dimension_semantics = [#tpu.dimension_semantics<parallel>], iteration_bounds = array<i64: 1>, scalar_prefetch = 0 : i64, scratch_operands = 0 : i64, tpu.core_type = #tpu.core_type<tc>, window_params = [{transform_indices = @transform_0, window_bounds = array<i64: 80, 512>}, {pipeline_mode = #tpu.pipeline_mode<synchronous>, transform_indices = @transform_1, window_bounds = array<i64: 8, 80>}, {pipeline_mode = #tpu.pipeline_mode<synchronous>, transform_indices = @transform_2, window_bounds = array<i64: 8, 1>}, {transform_indices = @transform_3, window_bounds = array<i64: 8, 512>}]} {
    %c0 = arith.constant 0 : index
    %c0_0 = arith.constant 0 : index
    %0 = vector.load %arg1[%c0, %c0_0] : memref<80x512xbf16, #tpu.memory_space<vmem>>, vector<80x512xbf16>
    %cst = arith.constant 0.000000e+00 : bf16
    %1 = vector.broadcast %cst : bf16 to vector<80x512xbf16>
    %2 = arith.maximumf %0, %1 : vector<80x512xbf16>
    %c0_1 = arith.constant 0 : index
    %c0_2 = arith.constant 0 : index
    %3 = vector.load %arg2[%c0_1, %c0_2] : memref<8x80xbf16, #tpu.memory_space<vmem>>, vector<8x80xbf16>
    %cst_3 = arith.constant dense<0.000000e+00> : vector<8x512xf32>
    %4 = tpu.matmul %3, %2, %cst_3 {dimension_numbers = #tpu.dot_dimension_numbers<[1], [0], [0], [1], [0, 0, 1, 1], [], []>} : vector<8x80xbf16>, vector<80x512xbf16>, vector<8x512xf32> -> vector<8x512xf32>
    %c0_4 = arith.constant 0 : index
    %c0_5 = arith.constant 0 : index
    %5 = vector.load %arg3[%c0_4, %c0_5] : memref<8x1xf32, #tpu.memory_space<vmem>>, vector<8x1xf32>
    %6 = vector.broadcast %5 : vector<8x1xf32> to vector<8x512xf32>
    %7 = arith.addf %4, %6 : vector<8x512xf32>
    %c0_6 = arith.constant 0 : index
    %c0_7 = arith.constant 0 : index
    %8 = vector.load %arg4[%c0_6, %c0_7] : memref<8x512xf32, #tpu.memory_space<vmem>>, vector<8x512xf32>
    tpu.vector_store %arg4[%c0_6, %c0_7], %7 {strides = array<i32>} : memref<8x512xf32, #tpu.memory_space<vmem>>, vector<8x512xf32>,
    return
  }
  func.func @transform_0(%arg0: i32) -> (i32, i32) {
    %c0_i32 = arith.constant 0 : i32
    %c0_i32_0 = arith.constant 0 : i32
    return %c0_i32, %arg0 : i32, i32
  }
  func.func @transform_1(%arg0: i32) -> (i32, i32) {
    %c0_i32 = arith.constant 0 : i32
    %c0_i32_0 = arith.constant 0 : i32
    %c0_i32_1 = arith.constant 0 : i32
    return %c0_i32, %c0_i32_0 : i32, i32
  }
  func.func @transform_2(%arg0: i32) -> (i32, i32) {
    %c0_i32 = arith.constant 0 : i32
    %c0_i32_0 = arith.constant 0 : i32
    %c0_i32_1 = arith.constant 0 : i32
    return %c0_i32, %c0_i32_0 : i32, i32
  }
  func.func @transform_3(%arg0: i32) -> (i32, i32) {
    %c0_i32 = arith.constant 0 : i32
    %c0_i32_0 = arith.constant 0 : i32
    return %c0_i32, %arg0 : i32, i32
  }
}

</mosaic_0001>

<bundles_post_ra>
// kernel: tpu_custom_call.1
= control target key start
LH: loop header
LB: loop body
LE: loop exit
PB: predicated region body
PF: predicated region fallthrough
CT: control target
= control target key end

     0   :  { %8 = vsyncpa [#allocation3], 0  ;;  %s414_s0 = inlined_call_operand.hbm [shape: bf16[80,512], index: 0, kind: input, shape index: {}]   ;;  %s415_s1 = inlined_call_operand.vmem [shape: bf16[8,80], index: 1, kind: input, shape index: {}]   ;;  %s416_s2 = inlined_call_operand.vmem [shape: f32[8,1], index: 2, kind: input, shape index: {}]   ;;  %s417_s3 = inlined_call_operand.hbm [shape: f32[8,512], index: 3, kind: output, shape index: {}]  }
   0x1   :  { %9 = vsyncpa [#allocation4], 0  ;;  %s354_s12 = smov [#allocation2]  }
   0x2   :  { %s15_s13 = sshll.u32 %s354_s12, 4  ;;  %s16_s13 = int_to_ptr.vmem [resolvable:$true] %s15_s13 }
   0x3   :  { %s318_s14 = scalar_lea.vmem %s16_s13, 2560  ;;  %p323_p1 = scmp.lt.s32.totalorder %s16_s13, %s16_s13 }
   0x4   :  { %p319_p0 = scmp.ne.s32.totalorder %s16_s13, %s318_s14  ;;  %p324_p2 = scmp.lt.s32.totalorder %s318_s14, %s318_s14 }
   0x6   :  { %p325_p3 = por %p324_p2, %p323_p1 }
   0x8   :  { %p326_p4 = pnand %p325_p3, %p319_p0 }
   0xa   :  { %329 = shalt.err (!%p326_p4)
}
   0xb   :  { %s355_s15 = smov 256   ;;  %s356_s16 = smov 16  }
   0xc   :  { %21 = dma.hbm_to_vmem [thread:$0]  %s414_s0, 2560, %s16_s13, [#allocation3], %s355_s15, %s355_s15, %s356_s16  }
   0xd   :  { %350 = dma.done.wait [#allocation3], 2560  }
   0xe   :  { %351 = vsyncadd [#allocation3], 4294964736  ;;  %v357_v0 = vmov 0   ;;  %v46_v1 = vld [vmem:[#allocation2 + $0x80] sm:$0xff]  ;;  %v48_v2 = vld [vmem:[#allocation2 + $0x90] sm:$0xff]  ;;  %vm177_vm0 = vcmask 654336  }
   0xf   :  { %213 = vmatprep.mubr.bf16.mxu0 %v357_v0  ;;  %254 = vmatprep.mubr.bf16.mxu1 %v357_v0  ;;  %v47_v3 = vld [vmem:[#allocation2 + $0x88] sm:$0xff]  ;;  %v66_v4 = vmax.bf16 %v357_v0, %v46_v1  ;;  %v68_v5 = vmax.bf16 %v357_v0, %v48_v2  ;;  %v49_v6 = vld [vmem:[#allocation2 + $0x98] sm:$0xff]  ;;  %v42_v8 = vld [vmem:[#allocation2 + $0x60] sm:$0xff]  ;;  %s358_s21 = smov [#allocation5]  }
  0x10   :  { %309 = vset.pattern.permute.xlu0 %v357_v0  ;;  %v67_v7 = vmax.bf16 %v357_v0, %v47_v3  ;;  %v44_v9 = vld [vmem:[#allocation2 + $0x70] sm:$0xff]  ;;  %v69_v10 = vmax.bf16 %v357_v0, %v49_v6  ;;  %v62_v11 = vmax.bf16 %v357_v0, %v42_v8  ;;  %v43_v13 = vld [vmem:[#allocation2 + $0x68] sm:$0xff]  ;;  %v45_v14 = vld [vmem:[#allocation2 + $0x78] sm:$0xff]  ;;  %s273_s22 = sshll.u32 %s358_s21, 4  ;;  %s274_s22 = int_to_ptr.vmem [resolvable:$true] %s273_s22 }
  0x11   :  { %v64_v12 = vmax.bf16 %v357_v0, %v44_v9  ;;  %v38_v15 = vld [vmem:[#allocation2 + $0x40] sm:$0xff]  ;;  %v299_v16 = vcombine.high %v66_v4, %v68_v5  ;;  %v298_v17 = vcombine.low %v66_v4, %v68_v5  ;;  %v63_v18 = vmax.bf16 %v357_v0, %v43_v13  ;;  %v40_v20 = vld [vmem:[#allocation2 + $0x50] sm:$0xff]  ;;  %v39_v21 = vld [vmem:[#allocation2 + $0x48] sm:$0xff]  ;;  %p335_p6 = scmp.lt.s32.totalorder %s274_s22, %s274_s22 }
  0x12   :  { %v65_v19 = vmax.bf16 %v357_v0, %v45_v14  ;;  %v41_v22 = vld [vmem:[#allocation2 + $0x58] sm:$0xff]  ;;  %v301_v23 = vcombine.high %v67_v7, %v69_v10  ;;  %v300_v24 = vcombine.low %v67_v7, %v69_v10  ;;  %v34_v26 = vld [vmem:[#allocation2 + $0x20] sm:$0xff]  ;;  %v36_v27 = vld [vmem:[#allocation2 + $0x30] sm:$0xff]  ;;  %v58_v30 = vmax.bf16 %v357_v0, %v38_v15 }
  0x13   :  { %v295_v25 = vcombine.high %v62_v11, %v64_v12  ;;  %187 = vmatprep.subr.bf16.mxu0 %v299_v16  ;;  %v294_v29 = vcombine.low %v62_v11, %v64_v12  ;;  %v60_v31 = vmax.bf16 %v357_v0, %v40_v20  ;;  %v35_v32 = vld [vmem:[#allocation2 + $0x28] sm:$0xff]  ;;  %v37_v33 = vld [vmem:[#allocation2 + $0x38] sm:$0xff]  ;;  %v59_v35 = vmax.bf16 %v357_v0, %v39_v21  ;;  %v71_v40 = vld [vmem:[%s416_s2] sm:$0xff] }
  0x14   :  { %v297_v28 = vcombine.high %v63_v18, %v65_v19  ;;  %228 = vmatprep.subr.bf16.mxu1 %v301_v23  ;;  %188 = vmatpush1.bf16.msra.mxu0 %v298_v17  ;;  %v296_v34 = vcombine.low %v63_v18, %v65_v19  ;;  %v61_v36 = vmax.bf16 %v357_v0, %v41_v22  ;;  %v30_v44 = vld [vmem:[#allocation2] sm:$0xff]  ;;  %v32_v45 = vld [vmem:[#allocation2 + $0x10] sm:$0xff]  ;;  %v31_v46 = vld [vmem:[#allocation2 + $0x8] sm:$0xff] }
  0x15   :  { %229 = vmatpush1.bf16.msra.mxu1 %v300_v24  ;;  %189 = vmatprep.subr.bf16.mxu0 %v295_v25  ;;  %v291_v37 = vcombine.high %v58_v30, %v60_v31  ;;  %v54_v38 = vmax.bf16 %v357_v0, %v34_v26  ;;  %v56_v39 = vmax.bf16 %v357_v0, %v36_v27  ;;  %v33_v47 = vld [vmem:[#allocation2 + $0x18] sm:$0xff]  ;;  %v70_v62 = vld [vmem:[%s415_s1] sm:$0xf]  ;;  %s330_s1 = scalar_lea.vmem %s274_s22, 512 }
  0x16   :  { %230 = vmatprep.subr.bf16.mxu1 %v297_v28  ;;  %v293_v41 = vcombine.high %v59_v35, %v61_v36  ;;  %v55_v42 = vmax.bf16 %v357_v0, %v35_v32  ;;  %v57_v43 = vmax.bf16 %v357_v0, %v37_v33  ;;  %74 = vperm.xlu0 %309, %v71_v40   ;;  %p331_p5 = scmp.ne.s32.totalorder %s274_s22, %s330_s1  ;;  %p336_p7 = scmp.lt.s32.totalorder %s330_s1, %s330_s1 }
  0x17   :  { %v290_v48 = vcombine.low %v58_v30, %v60_v31  ;;  %v292_v49 = vcombine.low %v59_v35, %v61_v36  ;;  %v287_v50 = vcombine.high %v54_v38, %v56_v39  ;;  %v50_v51 = vmax.bf16 %v357_v0, %v30_v44 }
  0x18   :  { %190 = vmatpush1.bf16.msra.mxu0 %v294_v29  ;;  %v52_v52 = vmax.bf16 %v357_v0, %v32_v45  ;;  %v289_v53 = vcombine.high %v55_v42, %v57_v43  ;;  %v51_v54 = vmax.bf16 %v357_v0, %v31_v46  ;;  %v53_v55 = vmax.bf16 %v357_v0, %v33_v47  ;;  %p337_p8 = por %p336_p7, %p335_p6 }
  0x19   :  { %231 = vmatpush1.bf16.msra.mxu1 %v296_v34  ;;  %191 = vmatprep.subr.bf16.mxu0 %v291_v37  ;;  %v286_v56 = vcombine.low %v54_v38, %v56_v39  ;;  %v288_v57 = vcombine.low %v55_v42, %v57_v43 }
  0x1a   :  { %232 = vmatprep.subr.bf16.mxu1 %v293_v41  ;;  %v283_v58 = vcombine.high %v50_v51, %v52_v52  ;;  %v285_v59 = vcombine.high %v51_v54, %v53_v55  ;;  %v282_v60 = vcombine.low %v50_v51, %v52_v52  ;;  %v284_v61 = vcombine.low %v51_v54, %v53_v55  ;;  %p338_p9 = pnand %p337_p8, %p331_p5 }
  0x1c   :  { %192 = vmatpush1.bf16.msra.mxu0 %v290_v48 }
  0x1d   :  { %233 = vmatpush1.bf16.msra.mxu1 %v292_v49  ;;  %193 = vmatprep.subr.bf16.mxu0 %v287_v50 }
  0x1e   :  { %234 = vmatprep.subr.bf16.mxu1 %v289_v53 }
  0x20   :  { %194 = vmatpush1.bf16.msra.mxu0 %v286_v56 }
  0x21   :  { %235 = vmatpush1.bf16.msra.mxu1 %v288_v57  ;;  %195 = vmatprep.subr.bf16.mxu0 %v283_v58 }
  0x22   :  { %236 = vmatprep.subr.bf16.mxu1 %v285_v59 }
  0x24   :  { %196 = vmatpush1.bf16.msra.mxu0 %v282_v60 }
  0x25   :  { %237 = vmatpush1.bf16.msra.mxu1 %v284_v61 }
  0x27   :  { %302 = vmatmul.mubr.msk.bf16.vlgmr.msra.gmra.mxu0 %vm177_vm0, %v70_v62 }
  0x28   :  { %303 = vmatmul.mubr.msk.bf16.vlgmr.msra.gmra.mxu1 %vm177_vm0, %v70_v62 }
  0x91   :  { %v75_v63 = vpop.permute.xlu0 %74 }
  0xe7   :  { %v215_v0 = vpop.f32.mrf.mxu0 }
  0xe8   :  { %v216_v1 = vadd.f32 %v215_v0, %v75_v63  ;;  %v256_v2 = vpop.f32.mrf.mxu1 }
  0xe9   :  { %v257_v3 = vadd.f32 %v256_v2, %v75_v63  ;;  %v217_v4 = vpop.f32.mrf.mxu0 }
  0xea   :  { %263 = vst [vmem:[#allocation5] sm:$0xff] %v216_v1  ;;  %v218_v5 = vadd.f32 %v217_v4, %v75_v63  ;;  %v258_v6 = vpop.f32.mrf.mxu1 }
  0xeb   :  { %265 = vst [vmem:[#allocation5 + $0x10] sm:$0xff] %v257_v3  ;;  %v259_v7 = vadd.f32 %v258_v6, %v75_v63  ;;  %v219_v8 = vpop.f32.mrf.mxu0 }
  0xec   :  { %264 = vst [vmem:[#allocation5 + $0x8] sm:$0xff] %v218_v5  ;;  %v260_v9 = vpop.f32.mrf.mxu1 }
  0xed   :  { %266 = vst [vmem:[#allocation5 + $0x18] sm:$0xff] %v259_v7  ;;  %v220_v10 = vpop.f32.mrf.mxu0 }
  0xee   :  { %v261_v11 = vpop.f32.mrf.mxu1 }
  0xef   :  { %341 = shalt.err (!%p338_p9)
}
  0xf0   :  { %276 = dma.vmem_to_hbm [thread:$0]  %s274_s22, 512, %s417_s3, [#allocation4]  }
  0xf1   :  { %352 = dma.done.wait [#allocation4], 512  }
  0xf2   :  { %353 = vsyncadd [#allocation4], 4294966784 }
  0xf3   :  { %280 = vsyncpa [#allocation3], 1 }
  0xf4   :  { %281 = vsyncpa [#allocation4], 1 }

</bundles_post_ra>
